<compile_context>
chip_gen: v7x
topology: tpu7x:2x2x1
jax: 0.10.0
libtpu: 0.0.40
codegen_flags: <defaults>
</compile_context>

<pallas_src>
import math
from functools import partial

import jax
import jax.numpy as jnp
from jax.experimental import pallas as pl
from jax.experimental.pallas import tpu as pltpu

EPS = 1e-6


# ----------------------------- Pallas kernel -----------------------------

def layernorm_kernel(x_ref, a_ref, b_ref, o_ref, *, eps):
    # x: (rows, D); alpha/beta: (1, D), broadcast over rows.
    xf = x_ref[...].astype(jnp.float32)
    d = xf.shape[-1]

    # One pass over x for both statistics (no centered-x temporary).
    sum_x = jnp.sum(xf, axis=-1, keepdims=True)
    sum_x2 = jnp.sum(xf * xf, axis=-1, keepdims=True)
    mean = sum_x * (1.0 / d)
    # Unbiased variance (torch x.std default), clamped against cancellation.
    var = jnp.maximum(sum_x2 - sum_x * mean, 0.0) * (1.0 / (d - 1))
    std = jnp.sqrt(var)
    inv = 1.0 / (std + eps)                      # exact: approx recip fails tol

    a = a_ref[...].astype(jnp.float32)
    b = b_ref[...].astype(jnp.float32)
    scale = a * inv                              # (rows, D)
    shift = b - mean * scale                     # (rows, D)
    o_ref[...] = (xf * scale + shift).astype(o_ref.dtype)


# ----------------------------- wrapper -----------------------------

def layer_norm(x, alpha, beta, eps=EPS, *,
               single_block_bytes=8 << 20,      # whole-slab path if I/O below this
               block_budget_bytes=4 << 20):     # per-buffer VMEM budget (grid path)
    orig_shape = x.shape
    D = orig_shape[-1]
    N = math.prod(orig_shape[:-1]) if len(orig_shape) > 1 else 1

    x2d = x.reshape(N, D)                        # no dtype cast: keep I/O narrow
    a2d = alpha.reshape(1, D)
    b2d = beta.reshape(1, D)

    itemsize = jnp.dtype(x.dtype).itemsize
    p_itemsize = jnp.dtype(alpha.dtype).itemsize
    io_bytes = 2 * N * D * itemsize + 2 * D * p_itemsize

    kernel = partial(layernorm_kernel, eps=eps)
    cost = pl.CostEstimate(
        flops=8 * N * D,
        transcendentals=N,                       # sqrt per row
        bytes_accessed=io_bytes,
    )

    if 2 * N * D * itemsize <= single_block_bytes:
        # Small problem: whole slab resident in VMEM, single launch, no grid.
        out = pl.pallas_call(
            kernel,
            out_shape=jax.ShapeDtypeStruct((N, D), x.dtype),
            in_specs=[pl.BlockSpec(memory_space=pltpu.MemorySpace.VMEM)] * 3,
            out_specs=pl.BlockSpec(memory_space=pltpu.MemorySpace.VMEM),
            cost_estimate=cost,
        )(x2d, a2d, b2d)
    else:
        # Large inputs: row-tiled, pipelined, "parallel" so v7x shards across
        # both TensorCores. block_rows derived from a VMEM budget (multiple of 8).
        row_bytes = D * itemsize
        max_rows = max(8, (block_budget_bytes // max(row_bytes, 1)) // 8 * 8)
        block_rows = N if max_rows >= N else max_rows
        grid = (pl.cdiv(N, block_rows),)

        # in+out double-buffered + f32 compute temporaries + params + headroom.
        blk_bytes = block_rows * D * itemsize
        vmem_limit = min(96 << 20,
                         4 * blk_bytes + 3 * block_rows * D * 4
                         + 2 * D * p_itemsize + (2 << 20))

        out = pl.pallas_call(
            kernel,
            out_shape=jax.ShapeDtypeStruct((N, D), x.dtype),
            grid=grid,
            in_specs=[pl.BlockSpec((block_rows, D), lambda i: (i, 0)),
                      pl.BlockSpec((1, D), lambda i: (0, 0)),
                      pl.BlockSpec((1, D), lambda i: (0, 0))],
            out_specs=pl.BlockSpec((block_rows, D), lambda i: (i, 0)),
            compiler_params=pltpu.CompilerParams(
                dimension_semantics=("parallel",),
                vmem_limit_bytes=int(vmem_limit)),
            cost_estimate=cost,
        )(x2d, a2d, b2d)

    return out.reshape(orig_shape)


# ----------------------------- reference (pure JAX) -----------------------------

def layer_norm_ref(x, alpha, beta, eps=EPS):
    xf = x.astype(jnp.float32)
    mean = jnp.mean(xf, axis=-1, keepdims=True)
    var = jnp.sum((xf - mean) ** 2, axis=-1, keepdims=True) / (x.shape[-1] - 1)
    std = jnp.sqrt(var)
    return (alpha * (xf - mean) / (std + eps) + beta).astype(x.dtype)


# ----------------------------- main -----------------------------

if __name__ == "__main__":
    key = jax.random.PRNGKey(0)
    kx, ka, kb, kx2 = jax.random.split(key, 4)

    B, S, D = 2, 8, 32
    x = jax.random.normal(kx, (B, S, D), jnp.float32)
    alpha = 1.0 + 0.1 * jax.random.normal(ka, (D,), jnp.float32)
    beta = 0.05 * jax.random.normal(kb, (D,), jnp.float32)

    # Small case: single-block VMEM-resident path.
    out = layer_norm(x, alpha, beta)
    jax.block_until_ready(out)
    assert out.shape == (B, S, D)
    ref = layer_norm_ref(x, alpha, beta)
    err = float(jnp.max(jnp.abs(out - ref)))
    assert jnp.allclose(out, ref, rtol=1e-4, atol=1e-4), err

    # Exercise the row-tiled grid path (forced small budget), incl. tail block.
    x2 = jax.random.normal(kx2, (5, 13, D), jnp.float32)
    out2 = layer_norm(x2, alpha, beta,
                      single_block_bytes=0, block_budget_bytes=1024)
    jax.block_until_ready(out2)
    ref2 = layer_norm_ref(x2, alpha, beta)
    err2 = float(jnp.max(jnp.abs(out2 - ref2)))
    assert jnp.allclose(out2, ref2, rtol=1e-4, atol=1e-4), err2

    print("KERNEL_OK")
</pallas_src>

<mosaic_0001>
module attributes {stable_mosaic.version = 11 : i64} {
  func.func @layernorm_kernel(%arg0: memref<16x32xf32, #tpu.memory_space<vmem>>, %arg1: memref<1x32xf32, #tpu.memory_space<vmem>>, %arg2: memref<1x32xf32, #tpu.memory_space<vmem>>, %arg3: memref<16x32xf32, #tpu.memory_space<vmem>>) attributes {dimension_semantics = [], scalar_prefetch = 0 : i64, scratch_operands = 0 : i64, tpu.core_type = #tpu.core_type<tc>} {
    %c0 = arith.constant 0 : index
    %c0_0 = arith.constant 0 : index
    %0 = vector.load %arg0[%c0, %c0_0] : memref<16x32xf32, #tpu.memory_space<vmem>>, vector<16x32xf32>
    %cst = arith.constant dense<0.000000e+00> : vector<16xf32>
    %1 = vector.multi_reduction <add>, %0, %cst [1] : vector<16x32xf32> to vector<16xf32>
    %2 = vector.shape_cast %1 : vector<16xf32> to vector<16x1xf32>
    %3 = arith.mulf %0, %0 : vector<16x32xf32>
    %cst_1 = arith.constant dense<0.000000e+00> : vector<16xf32>
    %4 = vector.multi_reduction <add>, %3, %cst_1 [1] : vector<16x32xf32> to vector<16xf32>
    %5 = vector.shape_cast %4 : vector<16xf32> to vector<16x1xf32>
    %cst_2 = arith.constant 3.125000e-02 : f32
    %6 = vector.broadcast %cst_2 : f32 to vector<16x1xf32>
    %7 = arith.mulf %2, %6 : vector<16x1xf32>
    %8 = arith.mulf %2, %7 : vector<16x1xf32>
    %9 = arith.subf %5, %8 : vector<16x1xf32>
    %cst_3 = arith.constant 0.000000e+00 : f32
    %10 = vector.broadcast %cst_3 : f32 to vector<16x1xf32>
    %11 = arith.maximumf %9, %10 : vector<16x1xf32>
    %cst_4 = arith.constant 0.0322580636 : f32
    %12 = vector.broadcast %cst_4 : f32 to vector<16x1xf32>
    %13 = arith.mulf %11, %12 : vector<16x1xf32>
    %14 = math.sqrt %13 : vector<16x1xf32>
    %cst_5 = arith.constant 9.99999997E-7 : f32
    %15 = vector.broadcast %cst_5 : f32 to vector<16x1xf32>
    %16 = arith.addf %14, %15 : vector<16x1xf32>
    %cst_6 = arith.constant 1.000000e+00 : f32
    %17 = vector.broadcast %cst_6 : f32 to vector<16x1xf32>
    %18 = arith.divf %17, %16 : vector<16x1xf32>
    %c0_7 = arith.constant 0 : index
    %c0_8 = arith.constant 0 : index
    %19 = vector.load %arg1[%c0_7, %c0_8] : memref<1x32xf32, #tpu.memory_space<vmem>>, vector<1x32xf32>
    %c0_9 = arith.constant 0 : index
    %c0_10 = arith.constant 0 : index
    %20 = vector.load %arg2[%c0_9, %c0_10] : memref<1x32xf32, #tpu.memory_space<vmem>>, vector<1x32xf32>
    %21 = vector.broadcast %19 : vector<1x32xf32> to vector<16x32xf32>
    %22 = vector.broadcast %18 : vector<16x1xf32> to vector<16x32xf32>
    %23 = arith.mulf %21, %22 : vector<16x32xf32>
    %24 = vector.broadcast %7 : vector<16x1xf32> to vector<16x32xf32>
    %25 = arith.mulf %24, %23 : vector<16x32xf32>
    %26 = vector.broadcast %20 : vector<1x32xf32> to vector<16x32xf32>
    %27 = arith.subf %26, %25 : vector<16x32xf32>
    %28 = arith.mulf %0, %23 : vector<16x32xf32>
    %29 = arith.addf %28, %27 : vector<16x32xf32>
    %c0_11 = arith.constant 0 : index
    %c0_12 = arith.constant 0 : index
    %30 = vector.load %arg3[%c0_11, %c0_12] : memref<16x32xf32, #tpu.memory_space<vmem>>, vector<16x32xf32>
    tpu.vector_store %arg3[%c0_11, %c0_12], %29 {strides = array<i32>} : memref<16x32xf32, #tpu.memory_space<vmem>>, vector<16x32xf32>,
    return
  }
}

</mosaic_0001>

<bundles_post_ra>
// kernel: tpu_custom_call.1
= control target key start
LH: loop header
LB: loop body
LE: loop exit
PB: predicated region body
PF: predicated region fallthrough
CT: control target
= control target key end

     0   :  { %8 = vsyncpa [#allocation3], 0  ;;  %s247_s0 = inlined_call_operand.hbm [shape: f32[16,32], index: 0, kind: input, shape index: {}]   ;;  %s248_s1 = inlined_call_operand.vmem [shape: f32[1,32], index: 1, kind: input, shape index: {}]   ;;  %s249_s2 = inlined_call_operand.vmem [shape: f32[1,32], index: 2, kind: input, shape index: {}]   ;;  %s250_s3 = inlined_call_operand.hbm [shape: f32[16,32], index: 3, kind: output, shape index: {}]  }
   0x1   :  { %9 = vsyncpa [#allocation4], 0  ;;  %s181_s12 = smov [#allocation2]   ;;  %s133_s16 = scalar_lea.hbm %s247_s0, 256 }
   0x2   :  { %s15_s13 = sshll.u32 %s181_s12, 4  ;;  %p134_p0 = scmp.ne.s32.totalorder %s247_s0, %s133_s16  ;;  %s16_s13 = int_to_ptr.vmem [resolvable:$true] %s15_s13 }
   0x3   :  { %p137_p1 = scmp.lt.u32.totalorder %s133_s16, %s247_s0 }
   0x5   :  { %p139_p2 = pnand %p137_p1, %p134_p0 }
   0x7   :  { %142 = shalt.err (!%p139_p2)
}
   0x8   :  { %s143_s21 = scalar_lea.vmem %s16_s13, 256  ;;  %p148_p4 = scmp.lt.s32.totalorder %s16_s13, %s16_s13 }
   0x9   :  { %p144_p3 = scmp.ne.s32.totalorder %s16_s13, %s143_s21  ;;  %p149_p5 = scmp.lt.s32.totalorder %s143_s21, %s143_s21 }
   0xb   :  { %p150_p6 = por %p149_p5, %p148_p4 }
   0xd   :  { %p151_p7 = pnand %p150_p6, %p144_p3 }
   0xf   :  { %154 = shalt.err (!%p151_p7)
}
  0x10   :  { %s182_s22 = smov 128   ;;  %s183_s23 = smov 8  }
  0x11   :  { %21 = dma.hbm_to_vmem [thread:$0]  %s247_s0, 256, %s16_s13, [#allocation3], %s182_s22, %s182_s22, %s183_s23  }
  0x12   :  { %177 = dma.done.wait [#allocation3], 256  }
  0x13   :  { %178 = vsyncadd [#allocation3], 4294967040  ;;  %vm31_vm0 = vcmask 261120   ;;  %v29_v0 = vld [vmem:[#allocation2] sm:$0xff]  ;;  %v30_v1 = vld [vmem:[#allocation2 + $0x8] sm:$0xff]  ;;  %s184_s29 = smov [#allocation5]  }
  0x14   :  { %v32_v2 = vsel %vm31_vm0, %v29_v0, 0.0  ;;  %v38_v3 = vmul.f32 %v29_v0, %v29_v0  ;;  %v39_v4 = vmul.f32 %v30_v1, %v30_v1  ;;  %v35_v6 = vsel %vm31_vm0, %v30_v1, 0.0  ;;  %v119_v34 = vld [vmem:[%s248_s1] ss:$0 sm:$0xff]  ;;  %s107_s30 = sshll.u32 %s184_s29, 4  ;;  %s108_s30 = int_to_ptr.vmem [resolvable:$true] %s107_s30 }
  0x15   :  { %33 = vadd.xlane.f32.xlu0 %v32_v2  ;;  %v120_v37 = vld [vmem:[%s249_s2] ss:$0 sm:$0xff]  ;;  %s155_s1 = scalar_lea.vmem %s108_s30, 256  ;;  %p160_p9 = scmp.lt.s32.totalorder %s108_s30, %s108_s30 }
  0x16   :  { %v40_v5 = vsel %vm31_vm0, %v38_v3, 0.0  ;;  %v43_v7 = vsel %vm31_vm0, %v39_v4, 0.0  ;;  %p156_p8 = scmp.ne.s32.totalorder %s108_s30, %s155_s1  ;;  %p161_p10 = scmp.lt.s32.totalorder %s155_s1, %s155_s1 }
  0x17   :  { %41 = vadd.xlane.f32.xlu1 %v40_v5 }
  0x18   :  { %p162_p11 = por %p161_p10, %p160_p9 }
  0x19   :  { %36 = vadd.xlane.f32.xlu0 %v35_v6 }
  0x1a   :  { %p163_p12 = pnand %p162_p11, %p156_p8 }
  0x1b   :  { %44 = vadd.xlane.f32.xlu1 %v43_v7 }
  0xa2   :  { %v34_v8 = vpop.xlane.xlu0 %33 }
  0xa3   :  { %v46_v9 = vmul.f32 0.03125, %v34_v8 }
  0xa4   :  { %v42_v10 = vpop.xlane.xlu1 %41 }
  0xa5   :  { %v48_v11 = vmul.f32 %v46_v9, %v34_v8 }
  0xa6   :  { %v37_v12 = vpop.xlane.xlu0 %36 }
  0xa7   :  { %v50_v13 = vsub.f32 %v42_v10, %v48_v11  ;;  %v47_v14 = vmul.f32 0.03125, %v37_v12 }
  0xa8   :  { %v45_v15 = vpop.xlane.xlu1 %44 }
  0xa9   :  { %v52_v16 = vmax.f32 %v50_v13, 0.0  ;;  %v49_v17 = vmul.f32 %v47_v14, %v37_v12 }
  0xab   :  { %v54_v18 = vmul.f32 0.032258064, %v52_v16  ;;  %v51_v19 = vsub.f32 %v45_v15, %v49_v17 }
  0xad   :  { %125 = vrsqrt.f32 %v54_v18  ;;  %v53_v20 = vmax.f32 %v51_v19, 0.0  ;;  %vm58_vm1 = vcmp.eq.f32.partialorder %v54_v18, inf  ;;  %v61_v24 = vand.u32 2147483648, %v54_v18 }
  0xae   :  { %vm60_vm2 = vcmp.eq.f32.partialorder %v54_v18, 0.0 }
  0xaf   :  { %v55_v21 = vmul.f32 0.032258064, %v53_v20 }
  0xb1   :  { %127 = vrsqrt.f32 %v55_v21  ;;  %vm65_vm3 = vcmp.eq.f32.partialorder %v55_v21, inf  ;;  %v68_v30 = vand.u32 2147483648, %v55_v21  ;;  %vm67_vm4 = vcmp.eq.f32.partialorder %v55_v21, 0.0 }
  0xb7   :  { %v126_v22 = vpop.eup %125 }
  0xb8   :  { %v57_v23 = vmul.f32 %v126_v22, %v54_v18 }
  0xba   :  { %v59_v25 = vsel %vm58_vm1, %v54_v18, %v57_v23 }
  0xbb   :  { %v62_v26 = vsel %vm60_vm2, %v61_v24, %v59_v25  ;;  %v128_v27 = vpop.eup %127 }
  0xbc   :  { %v70_v28 = vadd.f32 1e-06, %v62_v26  ;;  %v64_v29 = vmul.f32 %v128_v27, %v55_v21 }
  0xbe   :  { %129 = vrcp.f32 %v70_v28  ;;  %v66_v31 = vsel %vm65_vm3, %v55_v21, %v64_v29 }
  0xbf   :  { %v69_v32 = vsel %vm67_vm4, %v68_v30, %v66_v31 }
  0xc0   :  { %v71_v33 = vadd.f32 1e-06, %v69_v32 }
  0xc2   :  { %131 = vrcp.f32 %v71_v33 }
  0xc8   :  { %v130_v35 = vpop.eup %129 }
  0xc9   :  { %v84_v36 = vmul.f32 %v130_v35, %v119_v34 }
  0xcb   :  { %v86_v38 = vmul.f32 %v84_v36, %v46_v9  ;;  %v96_v41 = vmul.f32 %v84_v36, %v29_v0 }
  0xcc   :  { %v132_v39 = vpop.eup %131 }
  0xcd   :  { %v94_v40 = vsub.f32 %v120_v37, %v86_v38  ;;  %v85_v42 = vmul.f32 %v132_v39, %v119_v34 }
  0xcf   :  { %v98_v43 = vadd.f32 %v96_v41, %v94_v40  ;;  %v87_v44 = vmul.f32 %v85_v42, %v47_v14  ;;  %v97_v46 = vmul.f32 %v85_v42, %v30_v1 }
  0xd1   :  { %100 = vst.msk [vmem:[#allocation5] sm:$0xff] %vm31_vm0, %v98_v43  ;;  %v95_v45 = vsub.f32 %v120_v37, %v87_v44 }
  0xd3   :  { %v99_v47 = vadd.f32 %v97_v46, %v95_v45 }
  0xd5   :  { %101 = vst.msk [vmem:[#allocation5 + $0x8] sm:$0xff] %vm31_vm0, %v99_v47 }
  0xd6   :  { %166 = shalt.err (!%p163_p12)
}
  0xd7   :  { %s167_s5 = scalar_lea.hbm %s250_s3, 256 }
  0xd8   :  { %p168_p13 = scmp.ne.s32.totalorder %s250_s3, %s167_s5  ;;  %p171_p0 = scmp.lt.u32.totalorder %s167_s5, %s250_s3 }
  0xda   :  { %p173_p1 = pnand %p171_p0, %p168_p13 }
  0xdc   :  { %176 = shalt.err (!%p173_p1)
}
  0xdd   :  { %113 = dma.vmem_to_hbm [thread:$0]  %s108_s30, 256, %s250_s3, [#allocation4], %s182_s22, %s182_s22, %s183_s23  }
  0xde   :  { %179 = dma.done.wait [#allocation4], 256  }
  0xdf   :  { %180 = vsyncadd [#allocation4], 4294967040 }
  0xe0   :  { %117 = vsyncpa [#allocation3], 1 }
  0xe1   :  { %118 = vsyncpa [#allocation4], 1 }

</bundles_post_ra>
